<compile_context>
chip_gen: v6e
topology: v6e:2x2x1
jax: 0.10.0
libtpu: 0.0.40
codegen_flags: <defaults>
</compile_context>

<pallas_src>
import jax
import jax.numpy as jnp
from jax.experimental import pallas as pl
from jax.experimental.pallas import tpu as pltpu


def _rope_kernel(cos_ref, sin_ref, x_ref, o_ref):
    # Blocks: cos/sin (rows, D) f32 tables (resident / periodic),
    #         x / o   (rows, D) lane-dense data blocks.
    x = x_ref[...].astype(jnp.float32)                      # (rows, D)
    d = x.shape[-1]
    lane_axis = x.ndim - 1
    # Pairwise swap on the XLU:  swapped[2k] = x[2k+1], swapped[2k+1] = x[2k].
    left = pltpu.roll(x, d - 1, lane_axis)                  # left[i]  = x[(i+1) % d]
    right = pltpu.roll(x, 1, lane_axis)                     # right[i] = x[(i-1) % d]
    lane = jax.lax.broadcasted_iota(jnp.int32, x.shape, lane_axis)
    swapped = jnp.where(lane % 2 == 0, left, right)
    # Sign of the sin term is folded into the table, so this is pure VPU work.
    out = x * cos_ref[...] + swapped * sin_ref[...]
    o_ref[...] = out.astype(o_ref.dtype)
    # TODO(synk): on v6e/v7x with bf16 x, the multiplies/add could stay in bf16
    # (bf16 VALU) to trim cast filler; kept f32 here for accuracy/portability.


def rope_forward(x, d_model, max_seq_len=1024):
    """Pallas implementation of RoPEPositionalEncoding.forward (seq_len=None)."""
    B, S, D = x.shape
    assert D == d_model and D % 2 == 0
    assert S <= max_seq_len, "sequence longer than max_seq_len"

    # ---- tiny wrapper-side table precompute (read-once / resident in kernel) ----
    inv_freq = 1.0 / (10000.0 ** (jnp.arange(0, D, 2, dtype=jnp.float32) / D))
    pos = jnp.arange(S, dtype=jnp.float32)
    freqs = pos[:, None] * inv_freq[None, :]                      # (S, D/2)
    cos_t = jnp.repeat(jnp.cos(freqs), 2, axis=-1)                # c0,c0,c1,c1,...
    sin_half = jnp.sin(freqs)
    sin_t = jnp.stack([-sin_half, sin_half], axis=-1).reshape(S, D)  # -s0,+s0,-s1,+s1,...
    # TODO(synk): for bf16 x with small batch, store the tables in bf16 to halve
    # the table-side HBM traffic.

    # ---- generation-aware VMEM / tile budgeting ----
    try:
        vmem_cap = int(getattr(pltpu.get_tpu_info(), "vmem_capacity_bytes",
                               64 * 1024 * 1024))
    except Exception:
        vmem_cap = 64 * 1024 * 1024
    vmem_limit = min(int(vmem_cap * 0.7), 100 * 1024 * 1024)

    itemsize = x.dtype.itemsize
    # Per-step footprint per row: 2x(x) + 2x(o) in x.dtype, 2x(cos) + 2x(sin) f32.
    per_row = D * (4 * itemsize + 16)
    rows_budget = max(8, (vmem_limit // 2) // per_row)
    rows_budget = min(rows_budget, max(8, (4 * 1024 * 1024) // (D * itemsize)))
    rows_budget = max(8, (rows_budget // 8) * 8)

    compiler_params = pltpu.CompilerParams(
        dimension_semantics=("parallel",),
        vmem_limit_bytes=vmem_limit,
    )

    if S % 8 == 0:
        # ---- main path: flattened, lane-dense 1-D row grid ----
        # TODO(synk): for D < 128 (per-head RoPE) fold rows into the lane axis
        # instead, to avoid narrow masked stores.
        x_flat = x.reshape(B * S, D)
        if S > rows_budget:
            # Largest multiple of 8 that divides S and fits the budget: tile
            # boundaries then align with sequence positions.
            tile_s, t = 8, 8
            while t <= rows_budget:
                if S % t == 0:
                    tile_s = t
                t += 8
            period = S // tile_s
            tab_map = lambda r: (r % period, 0)
            cos_tab, sin_tab = cos_t, sin_t
            n_tiles = (B * S) // tile_s
        else:
            # One tile spans m whole sequences; tables tiled m times, constant
            # block index -> DMA'd once and resident for the whole grid.
            m = max(1, min(B, rows_budget // S))
            tile_s = m * S
            tab_map = lambda r: (0, 0)
            cos_tab = jnp.tile(cos_t, (m, 1))
            sin_tab = jnp.tile(sin_t, (m, 1))
            n_tiles = pl.cdiv(B * S, tile_s)

        out = pl.pallas_call(
            _rope_kernel,
            out_shape=jax.ShapeDtypeStruct((B * S, D), x.dtype),
            grid=(n_tiles,),
            in_specs=[
                pl.BlockSpec((tile_s, D), tab_map),               # cos table
                pl.BlockSpec((tile_s, D), tab_map),               # signed sin table
                pl.BlockSpec((tile_s, D), lambda r: (r, 0)),      # x rows
            ],
            out_specs=pl.BlockSpec((tile_s, D), lambda r: (r, 0)),
            compiler_params=compiler_params,
        )(cos_tab, sin_tab, x_flat)
        out = out.reshape(B, S, D)
    else:
        # ---- fallback: one batch row per step, full (S, D) block ----
        # Block shape equals the full trailing array dims, so the (8,128) rule
        # holds for any S.  TODO(synk): tile D too if S*D ever exceeds VMEM here.
        out = pl.pallas_call(
            _rope_kernel,
            out_shape=jax.ShapeDtypeStruct((B, S, D), x.dtype),
            grid=(B,),
            in_specs=[
                pl.BlockSpec((S, D), lambda b: (0, 0)),
                pl.BlockSpec((S, D), lambda b: (0, 0)),
                pl.BlockSpec((pl.Squeezed(), S, D), lambda b: (b, 0, 0)),
            ],
            out_specs=pl.BlockSpec((pl.Squeezed(), S, D), lambda b: (b, 0, 0)),
            compiler_params=compiler_params,
        )(cos_t, sin_t, x)

    # Reproduce PyTorch's broadcast-induced extra leading singleton dim.
    return out[None]


def _rope_reference(x, d_model):
    """Pure-JAX reference mirroring the PyTorch forward exactly."""
    B, S, D = x.shape
    inv_freq = 1.0 / (10000.0 ** (jnp.arange(0, D, 2, dtype=jnp.float32) / D))
    seq_idx = jnp.arange(S, dtype=jnp.float32)
    sincos = jnp.einsum("i,j->ij", seq_idx, inv_freq)
    sin = jnp.sin(sincos)[None, None]   # (1,1,S,D/2)
    cos = jnp.cos(sincos)[None, None]
    xr = x.reshape(B, S, D // 2, 2)
    x1, x2 = xr[..., 0], xr[..., 1]     # (B,S,D/2)
    rope = jnp.stack([x1 * cos - x2 * sin, x1 * sin + x2 * cos], axis=-1)
    return rope.reshape(*rope.shape[:-2], -1)   # (1,B,S,D)


if __name__ == "__main__":
    B, S, D = 2, 8, 128
    key = jax.random.PRNGKey(0)
    x = jax.random.normal(key, (B, S, D), dtype=jnp.float32)

    out = jax.block_until_ready(rope_forward(x, d_model=D, max_seq_len=1024))

    ref = _rope_reference(x, d_model=D)
    assert out.shape == ref.shape == (1, B, S, D)
    assert jnp.allclose(out, ref, atol=1e-5, rtol=1e-5), \
        float(jnp.max(jnp.abs(out - ref)))

    print("KERNEL_OK")
</pallas_src>

<mosaic_0001>
module attributes {stable_mosaic.version = 11 : i64} {
  func.func @_rope_kernel(%arg0: i32, %arg1: memref<16x128xf32, #tpu.memory_space<vmem>>, %arg2: memref<16x128xf32, #tpu.memory_space<vmem>>, %arg3: memref<16x128xf32, #tpu.memory_space<vmem>>, %arg4: memref<16x128xf32, #tpu.memory_space<vmem>>) attributes {dimension_semantics = [#tpu.dimension_semantics<parallel>], iteration_bounds = array<i64: 1>, scalar_prefetch = 0 : i64, scratch_operands = 0 : i64, tpu.core_type = #tpu.core_type<tc>, window_params = [{pipeline_mode = #tpu.pipeline_mode<synchronous>, transform_indices = @transform_0, window_bounds = array<i64: 16, 128>}, {pipeline_mode = #tpu.pipeline_mode<synchronous>, transform_indices = @transform_1, window_bounds = array<i64: 16, 128>}, {transform_indices = @transform_2, window_bounds = array<i64: 16, 128>}, {transform_indices = @transform_3, window_bounds = array<i64: 16, 128>}]} {
    %c0 = arith.constant 0 : index
    %c0_0 = arith.constant 0 : index
    %0 = vector.load %arg3[%c0, %c0_0] : memref<16x128xf32, #tpu.memory_space<vmem>>, vector<16x128xf32>
    %c127_i32 = arith.constant 127 : i32
    %1 = tpu.dynamic_rotate %0 by %c127_i32 dim 1 : vector<16x128xf32>, i32 -> vector<16x128xf32>
    %c1_i32 = arith.constant 1 : i32
    %2 = tpu.dynamic_rotate %0 by %c1_i32 dim 1 : vector<16x128xf32>, i32 -> vector<16x128xf32>
    %3 = tpu.iota {dimensions = array<i32: 1>} : vector<16x128xi32>
    %c2_i32 = arith.constant 2 : i32
    %c0_i32 = arith.constant 0 : i32
    %4 = arith.cmpi eq, %c2_i32, %c0_i32 : i32
    %c1_i32_1 = arith.constant 1 : i32
    %5 = arith.select %4, %c1_i32_1, %c2_i32 : i32
    %6 = vector.broadcast %5 : i32 to vector<16x128xi32>
    %7 = arith.remsi %3, %6 : vector<16x128xi32>
    %c0_i32_2 = arith.constant 0 : i32
    %8 = vector.broadcast %c0_i32_2 : i32 to vector<16x128xi32>
    %9 = arith.cmpi ne, %7, %8 : vector<16x128xi32>
    %c0_i32_3 = arith.constant 0 : i32
    %10 = vector.broadcast %c0_i32_3 : i32 to vector<16x128xi32>
    %11 = arith.cmpi slt, %7, %10 : vector<16x128xi32>
    %c0_i32_4 = arith.constant 0 : i32
    %12 = arith.cmpi slt, %5, %c0_i32_4 : i32
    %13 = vector.broadcast %12 : i1 to vector<16x128xi1>
    %14 = vector.broadcast %13 : vector<16x128xi1> to vector<16x128xi1>
    %15 = arith.xori %11, %14 : vector<16x128xi1>
    %16 = arith.andi %15, %9 : vector<16x128xi1>
    %17 = vector.broadcast %5 : i32 to vector<16x128xi32>
    %18 = arith.addi %7, %17 : vector<16x128xi32>
    %19 = arith.select %16, %18, %7 : vector<16x128xi1>, vector<16x128xi32>
    %c0_i32_5 = arith.constant 0 : i32
    %20 = vector.broadcast %c0_i32_5 : i32 to vector<16x128xi32>
    %21 = arith.cmpi eq, %19, %20 : vector<16x128xi32>
    %22 = arith.select %21, %1, %2 : vector<16x128xi1>, vector<16x128xf32>
    %c0_6 = arith.constant 0 : index
    %c0_7 = arith.constant 0 : index
    %23 = vector.load %arg1[%c0_6, %c0_7] : memref<16x128xf32, #tpu.memory_space<vmem>>, vector<16x128xf32>
    %24 = arith.mulf %0, %23 : vector<16x128xf32>
    %c0_8 = arith.constant 0 : index
    %c0_9 = arith.constant 0 : index
    %25 = vector.load %arg2[%c0_8, %c0_9] : memref<16x128xf32, #tpu.memory_space<vmem>>, vector<16x128xf32>
    %26 = arith.mulf %22, %25 : vector<16x128xf32>
    %27 = arith.addf %24, %26 : vector<16x128xf32>
    %c0_10 = arith.constant 0 : index
    %c0_11 = arith.constant 0 : index
    %28 = vector.load %arg4[%c0_10, %c0_11] : memref<16x128xf32, #tpu.memory_space<vmem>>, vector<16x128xf32>
    tpu.vector_store %arg4[%c0_10, %c0_11], %27 {strides = array<i32>} : memref<16x128xf32, #tpu.memory_space<vmem>>, vector<16x128xf32>,
    return
  }
  func.func @transform_0(%arg0: i32) -> (i32, i32) {
    %c0_i32 = arith.constant 0 : i32
    %c0_i32_0 = arith.constant 0 : i32
    %c0_i32_1 = arith.constant 0 : i32
    return %c0_i32, %c0_i32_0 : i32, i32
  }
  func.func @transform_1(%arg0: i32) -> (i32, i32) {
    %c0_i32 = arith.constant 0 : i32
    %c0_i32_0 = arith.constant 0 : i32
    %c0_i32_1 = arith.constant 0 : i32
    return %c0_i32, %c0_i32_0 : i32, i32
  }
  func.func @transform_2(%arg0: i32) -> (i32, i32) {
    %c0_i32 = arith.constant 0 : i32
    %c0_i32_0 = arith.constant 0 : i32
    return %arg0, %c0_i32 : i32, i32
  }
  func.func @transform_3(%arg0: i32) -> (i32, i32) {
    %c0_i32 = arith.constant 0 : i32
    %c0_i32_0 = arith.constant 0 : i32
    return %arg0, %c0_i32 : i32, i32
  }
}

</mosaic_0001>

<bundles_post_ra>
// kernel: tpu_custom_call.1
= control target key start
LH: loop header
LB: loop body
LE: loop exit
PB: predicated region body
PF: predicated region fallthrough
CT: control target
= control target key end

     0   :  { %8 = vsyncpa [#allocation3], 0  ;;  %s267_s0 = inlined_call_operand.hbm [shape: f32[16,128], index: 0, kind: input, shape index: {}]   ;;  %s268_s1 = inlined_call_operand.hbm [shape: f32[16,128], index: 1, kind: input, shape index: {}]   ;;  %s269_s2 = inlined_call_operand.hbm [shape: f32[16,128], index: 2, kind: input, shape index: {}]   ;;  %s270_s3 = inlined_call_operand.hbm [shape: f32[16,128], index: 3, kind: output, shape index: {}]  }
   0x1   :  { %9 = vsyncpa [#allocation6], 0 }
   0x2   :  { %10 = vsyncpa [#allocation4], 0  ;;  %s207_s12 = smov [#allocation5]   ;;  %s208_s14 = smov [#allocation2]  }
   0x3   :  { %s28_s13 = sshll.u32 %s207_s12, 4  ;;  %s16_s15 = sshll.u32 %s208_s14, 4  ;;  %s29_s13 = int_to_ptr.vmem [resolvable:$true] %s28_s13  ;;  %s17_s15 = int_to_ptr.vmem [resolvable:$true] %s16_s15 }
   0x4   :  { %s129_s16 = scalar_lea.vmem %s29_s13, 256  ;;  %p134_p1 = scmp.lt.s32.totalorder %s29_s13, %s29_s13 }
   0x5   :  { %p130_p0 = scmp.ne.s32.totalorder %s29_s13, %s129_s16  ;;  %p135_p2 = scmp.lt.s32.totalorder %s129_s16, %s129_s16 }
   0x7   :  { %p136_p3 = por %p135_p2, %p134_p1 }
   0x9   :  { %p137_p4 = pnand %p136_p3, %p130_p0 }
   0xb   :  { %140 = shalt.err (!%p137_p4)
}
   0xc   :  { %s209_s17 = smov 128   ;;  %s210_s18 = smov 8  }
   0xd   :  { %34 = dma.hbm_to_vmem [thread:$0]  %s268_s1, 256, %s29_s13, [#allocation6], %s209_s17, %s209_s17, %s210_s18  }
   0xe   :  { %s149_s21 = scalar_lea.vmem %s17_s15, 256  ;;  %p154_p6 = scmp.lt.s32.totalorder %s17_s15, %s17_s15 }
   0xf   :  { %p150_p5 = scmp.ne.s32.totalorder %s17_s15, %s149_s21  ;;  %p155_p7 = scmp.lt.s32.totalorder %s149_s21, %s149_s21 }
  0x11   :  { %p156_p8 = por %p155_p7, %p154_p6 }
  0x13   :  { %p157_p9 = pnand %p156_p8, %p150_p5 }
  0x15   :  { %160 = shalt.err (!%p157_p9)
}
  0x16   :  { %22 = dma.hbm_to_vmem [thread:$0]  %s267_s0, 256, %s17_s15, [#allocation3], %s209_s17, %s209_s17, %s210_s18  }
  0x17   :  { %s211_s24 = smov [#allocation7]  }
  0x18   :  { %s40_s25 = sshll.u32 %s211_s24, 4  ;;  %s41_s25 = int_to_ptr.vmem [resolvable:$true] %s40_s25 }
  0x19   :  { %s169_s26 = scalar_lea.vmem %s41_s25, 256  ;;  %p174_p11 = scmp.lt.s32.totalorder %s41_s25, %s41_s25 }
  0x1a   :  { %p170_p10 = scmp.ne.s32.totalorder %s41_s25, %s169_s26  ;;  %p175_p12 = scmp.lt.s32.totalorder %s169_s26, %s169_s26 }
  0x1c   :  { %p176_p13 = por %p175_p12, %p174_p11 }
  0x1e   :  { %p177_p0 = pnand %p176_p13, %p170_p10 }
  0x20   :  { %180 = shalt.err (!%p177_p0)
}
  0x21   :  { %46 = dma.hbm_to_vmem [thread:$0]  %s269_s2, 256, %s41_s25, [#allocation6], %s209_s17, %s209_s17, %s210_s18  }
  0x22   :  { %201 = dma.done.wait [#allocation3], 256  }
  0x23   :  { %202 = vsyncadd [#allocation3], 4294967040 }
  0x24   :  { %203 = dma.done.wait [#allocation6], 512  }
  0x25   :  { %204 = vsyncadd [#allocation6], 4294966784  ;;  %v56_v0 = vld [vmem:[#allocation7] sm:$0xff]  ;;  %s212_s0 = smov 1   ;;  %s213_s28 = smov 127   ;;  %v57_v1 = vld [vmem:[#allocation7 + $0x8] sm:$0xff]  ;;  %v66_v2 = vlaneseq }
  0x26   :  { %62 = vrot.lane.b32.xlu1 %v56_v0, %s212_s0  ;;  %58 = vrot.lane.b32.xlu0 %v56_v0, %s213_s28  ;;  %v83_v5 = vld [vmem:[#allocation2] sm:$0xff]  ;;  %v87_v7 = vld [vmem:[#allocation5] sm:$0xff]  ;;  %v84_v11 = vld [vmem:[#allocation2 + $0x8] sm:$0xff]  ;;  %s214_s2 = smov [#allocation8]  }
  0x27   :  { %v67_v3 = vand.u32 127, %v66_v2  ;;  %v85_v8 = vmul.f32 %v83_v5, %v56_v0  ;;  %v88_v14 = vld [vmem:[#allocation5 + $0x8] sm:$0xff]  ;;  %v86_v15 = vmul.f32 %v84_v11, %v57_v1  ;;  %s100_s29 = sshll.u32 %s214_s2, 4  ;;  %s101_s29 = int_to_ptr.vmem [resolvable:$true] %s100_s29 }
  0x28   :  { %s181_s30 = scalar_lea.vmem %s101_s29, 256  ;;  %p186_p2 = scmp.lt.s32.totalorder %s101_s29, %s101_s29 }
  0x29   :  { %v72_v4 = vand.u32 1, %v67_v3  ;;  %p182_p1 = scmp.ne.s32.totalorder %s101_s29, %s181_s30  ;;  %p187_p3 = scmp.lt.s32.totalorder %s181_s30, %s181_s30 }
  0x2a   :  { %64 = vrot.lane.b32.xlu1 %v57_v1, %s212_s0  ;;  %60 = vrot.lane.b32.xlu0 %v57_v1, %s213_s28 }
  0x2b   :  { %vm253_vm0 = vcmp.eq.s32.totalorder %v72_v4, 0  ;;  %p188_p4 = por %p187_p3, %p186_p2 }
  0x2d   :  { %p189_p5 = pnand %p188_p4, %p182_p1 }
  0x98   :  { %v63_v9 = vpop.permute.xlu1 %62  ;;  %v59_v10 = vpop.permute.xlu0 %58 }
  0x99   :  { %v81_v12 = vsel %vm253_vm0, %v59_v10, %v63_v9 }
  0x9a   :  { %v89_v13 = vmul.f32 %v87_v7, %v81_v12 }
  0x9c   :  { %v91_v16 = vadd.f32 %v89_v13, %v85_v8  ;;  %v65_v17 = vpop.permute.xlu1 %64  ;;  %v61_v18 = vpop.permute.xlu0 %60 }
  0x9d   :  { %v82_v19 = vsel %vm253_vm0, %v61_v18, %v65_v17 }
  0x9e   :  { %93 = vst [vmem:[#allocation8] sm:$0xff] %v91_v16  ;;  %v90_v20 = vmul.f32 %v88_v14, %v82_v19 }
  0xa0   :  { %v92_v21 = vadd.f32 %v90_v20, %v86_v15 }
  0xa2   :  { %94 = vst [vmem:[#allocation8 + $0x8] sm:$0xff] %v92_v21 }
  0xa3   :  { %192 = shalt.err (!%p189_p5)
}
  0xa4   :  { %106 = dma.vmem_to_hbm [thread:$0]  %s101_s29, 256, %s270_s3, [#allocation4], %s209_s17, %s209_s17, %s210_s18  }
  0xa5   :  { %205 = dma.done.wait [#allocation4], 256  }
  0xa6   :  { %206 = vsyncadd [#allocation4], 4294967040 }
  0xa7   :  { %110 = vsyncpa [#allocation3], 1 }
  0xa8   :  { %111 = vsyncpa [#allocation6], 1 }
  0xa9   :  { %112 = vsyncpa [#allocation4], 1 }

</bundles_post_ra>
